<compile_context>
chip_gen: v5e
topology: v5e:2x2
jax: 0.10.0
libtpu: 0.0.40
codegen_flags: <defaults>
</compile_context>

<pallas_src>
import functools

import jax
import jax.numpy as jnp
from jax.experimental import pallas as pl
from jax.experimental.pallas import tpu as pltpu

_LANE = 128


def _round_up(x, m):
    return ((x + m - 1) // m) * m


def _pick_tile(dim, candidates):
    for c in candidates:
        if dim % c == 0:
            return c
    return dim


def _matmul_kernel(a_ref, b_ref, bias_ref, o_ref, acc_ref, *, add_bias, apply_relu):
    """Tiled matmul with f32 accumulator; bias/ReLU fused into the last-k epilogue."""
    k = pl.program_id(2)

    @pl.when(k == 0)
    def _():
        acc_ref[...] = jnp.zeros_like(acc_ref)

    acc_ref[...] += jnp.dot(a_ref[...], b_ref[...],
                            preferred_element_type=jnp.float32)

    @pl.when(k == pl.num_programs(2) - 1)
    def _():
        out = acc_ref[...]
        if add_bias:
            out = out + bias_ref[...]        # (1, tn) broadcasts over rows
        if apply_relu:
            out = jnp.maximum(out, 0.0)
        o_ref[...] = out.astype(o_ref.dtype)


def tiled_matmul(a, b, bias=None, *, apply_relu=False, out_dtype=jnp.float32):
    """out = a @ b (+ bias) (+ ReLU). All dims must be multiples of 128 (pre-padded)."""
    m, k = a.shape
    k2, n = b.shape
    assert k == k2
    assert m % _LANE == 0 and n % _LANE == 0 and k % _LANE == 0

    add_bias = bias is not None
    if bias is None:
        bias = jnp.zeros((1, n), jnp.float32)
    else:
        bias = bias.reshape(1, n).astype(jnp.float32)

    # Moderate tiles: fit comfortably in VMEM on v5e/v6e (128 MiB) and v7x (64 MiB).
    tm = _pick_tile(m, (256, 128))
    tn = _pick_tile(n, (256, 128))
    tk = _pick_tile(k, (512, 256, 128))

    kernel = functools.partial(_matmul_kernel,
                               add_bias=add_bias, apply_relu=apply_relu)
    return pl.pallas_call(
        kernel,
        out_shape=jax.ShapeDtypeStruct((m, n), out_dtype),
        grid_spec=pltpu.PrefetchScalarGridSpec(
            num_scalar_prefetch=0,
            grid=(m // tm, n // tn, k // tk),
            in_specs=[
                pl.BlockSpec((tm, tk), lambda i, j, kk: (i, kk)),
                pl.BlockSpec((tk, tn), lambda i, j, kk: (kk, j)),
                pl.BlockSpec((1, tn), lambda i, j, kk: (0, j)),
            ],
            out_specs=pl.BlockSpec((tm, tn), lambda i, j, kk: (i, j)),
            scratch_shapes=[pltpu.VMEM((tm, tn), jnp.float32)],
        ),
        compiler_params=pltpu.CompilerParams(
            dimension_semantics=("parallel", "parallel", "arbitrary")),
    )(a, b, bias)


def gcn_layer(a_hat_bf16, x, w, b, *, apply_relu):
    """One GCNConv layer on pre-padded operands: A_hat @ (x @ w) + b, optional ReLU."""
    # Stage 1: feature transform (cheap: N x Cin x F), f32 in, bf16 out so the
    # large aggregation matmul streams half the bytes.
    xw = tiled_matmul(x.astype(jnp.float32), w.astype(jnp.float32),
                      out_dtype=jnp.bfloat16)
    # Stage 2: normalized aggregation (dominant: N^2 x F), bf16 operands,
    # f32 accumulation, bias/ReLU fused into the epilogue.
    return tiled_matmul(a_hat_bf16, xw, bias=b, apply_relu=apply_relu,
                        out_dtype=jnp.float32)


def build_normalized_adjacency(edge_index, num_nodes):
    """Dense D^{-1/2}(A + I)D^{-1/2}, matching PyG gcn_norm (add_self_loops=True)."""
    src = edge_index[0]
    dst = edge_index[1]
    a = jnp.zeros((num_nodes, num_nodes), jnp.float32)
    # message flows src -> dst, aggregated at dst: rows = dst, cols = src
    a = a.at[dst, src].set(1.0)
    # Force self-loop weight to exactly 1.0 even if the graph already contains
    # self-loops (matches add_remaining_self_loops; avoids the 2.0 bug).
    a = jnp.where(jnp.eye(num_nodes, dtype=bool), 1.0, a)
    deg = a.sum(axis=1)                            # in-degree incl. self loop
    dinv_sqrt = jnp.where(deg > 0, 1.0 / jnp.sqrt(deg), 0.0)
    return dinv_sqrt[:, None] * a * dinv_sqrt[None, :]


def gcn_forward(x, edge_index, params):
    """Two-layer GCN: conv1 -> ReLU -> conv2 (dropout_rate=0.0 path)."""
    n, c_in = x.shape
    hidden = params["w1"].shape[1]
    f_out = params["w2"].shape[1]

    # Pad every dimension to a multiple of 128 (zero padding keeps the math
    # exact: padded nodes/features contribute nothing to real rows/cols).
    n_p = _round_up(n, _LANE)
    c_p = _round_up(c_in, _LANE)
    h_p = _round_up(hidden, _LANE)
    f_p = _round_up(f_out, _LANE)

    a_hat = build_normalized_adjacency(edge_index, n)
    a_hat_p = jnp.pad(a_hat, ((0, n_p - n), (0, n_p - n))).astype(jnp.bfloat16)
    x_p = jnp.pad(x.astype(jnp.float32), ((0, n_p - n), (0, c_p - c_in)))
    w1_p = jnp.pad(params["w1"].astype(jnp.float32),
                   ((0, c_p - c_in), (0, h_p - hidden)))
    b1_p = jnp.pad(params["b1"].astype(jnp.float32), ((0, h_p - hidden),))
    w2_p = jnp.pad(params["w2"].astype(jnp.float32),
                   ((0, h_p - hidden), (0, f_p - f_out)))
    b2_p = jnp.pad(params["b2"].astype(jnp.float32), ((0, f_p - f_out),))

    h = gcn_layer(a_hat_p, x_p, w1_p, b1_p, apply_relu=True)
    out = gcn_layer(a_hat_p, h, w2_p, b2_p, apply_relu=False)
    return out[:n, :f_out]


def init_params(key, in_channels, hidden_channels, out_channels):
    k1, k2 = jax.random.split(key)
    # Glorot-style deterministic init (matches GCNConv parameter shapes).
    w1 = jax.random.normal(k1, (in_channels, hidden_channels), jnp.float32) \
        * jnp.sqrt(2.0 / (in_channels + hidden_channels))
    w2 = jax.random.normal(k2, (hidden_channels, out_channels), jnp.float32) \
        * jnp.sqrt(2.0 / (hidden_channels + out_channels))
    b1 = jnp.zeros((hidden_channels,), jnp.float32)
    b2 = jnp.zeros((out_channels,), jnp.float32)
    return {"w1": w1, "b1": b1, "w2": w2, "b2": b2}


if __name__ == "__main__":
    key = jax.random.PRNGKey(0)
    k_x, k_p = jax.random.split(key)

    num_nodes = 8
    in_channels = 4
    hidden_channels = 32
    out_channels = 8

    # Deterministic node features (N, C_in).
    x = jax.random.normal(k_x, (num_nodes, in_channels), jnp.float32)

    # Small undirected ring graph, edge_index shape (2, E).
    src = jnp.arange(num_nodes, dtype=jnp.int32)
    dst = (src + 1) % num_nodes
    edge_index = jnp.concatenate(
        [jnp.stack([src, dst], axis=0), jnp.stack([dst, src], axis=0)], axis=1)

    params = init_params(k_p, in_channels, hidden_channels, out_channels)

    out = gcn_forward(x, edge_index, params)
    jax.block_until_ready(out)
    assert out.shape == (num_nodes, out_channels)
    print("KERNEL_OK")
</pallas_src>

<mosaic_0001>
module attributes {stable_mosaic.version = 11 : i64} {
  func.func @_matmul_kernel(%arg0: i32, %arg1: i32, %arg2: i32, %arg3: memref<128x128xf32, #tpu.memory_space<vmem>>, %arg4: memref<128x128xf32, #tpu.memory_space<vmem>>, %arg5: memref<1x128xf32, #tpu.memory_space<vmem>>, %arg6: memref<128x128xbf16, #tpu.memory_space<vmem>>, %arg7: memref<128x128xf32, #tpu.memory_space<vmem>>) attributes {dimension_semantics = [#tpu.dimension_semantics<parallel>, #tpu.dimension_semantics<parallel>, #tpu.dimension_semantics<arbitrary>], iteration_bounds = array<i64: 1, 1, 1>, scalar_prefetch = 0 : i64, scratch_operands = 1 : i64, tpu.core_type = #tpu.core_type<tc>, window_params = [{transform_indices = @transform_0, window_bounds = array<i64: 128, 128>}, {transform_indices = @transform_1, window_bounds = array<i64: 128, 128>}, {transform_indices = @transform_2, window_bounds = array<i64: 1, 128>}, {transform_indices = @transform_3, window_bounds = array<i64: 128, 128>}]} {
    %c0_i32 = arith.constant 0 : i32
    %0 = arith.cmpi eq, %arg2, %c0_i32 : i32
    %1 = arith.extui %0 : i1 to i32
    %c0_i32_0 = arith.constant 0 : i32
    %2 = arith.cmpi ne, %1, %c0_i32_0 : i32
    scf.if %2 {
      %cst_10 = arith.constant 0.000000e+00 : f32
      %12 = vector.broadcast %cst_10 : f32 to vector<128x128xf32>
      %c0_11 = arith.constant 0 : index
      %c0_12 = arith.constant 0 : index
      %13 = vector.load %arg7[%c0_11, %c0_12] : memref<128x128xf32, #tpu.memory_space<vmem>>, vector<128x128xf32>
      tpu.vector_store %arg7[%c0_11, %c0_12], %12 {strides = array<i32>} : memref<128x128xf32, #tpu.memory_space<vmem>>, vector<128x128xf32>,
    } else {
    }
    %c0 = arith.constant 0 : index
    %c0_1 = arith.constant 0 : index
    %3 = vector.load %arg7[%c0, %c0_1] : memref<128x128xf32, #tpu.memory_space<vmem>>, vector<128x128xf32>
    %c0_2 = arith.constant 0 : index
    %c0_3 = arith.constant 0 : index
    %4 = vector.load %arg3[%c0_2, %c0_3] : memref<128x128xf32, #tpu.memory_space<vmem>>, vector<128x128xf32>
    %c0_4 = arith.constant 0 : index
    %c0_5 = arith.constant 0 : index
    %5 = vector.load %arg4[%c0_4, %c0_5] : memref<128x128xf32, #tpu.memory_space<vmem>>, vector<128x128xf32>
    %cst = arith.constant dense<0.000000e+00> : vector<128x128xf32>
    %6 = tpu.matmul %4, %5, %cst {dimension_numbers = #tpu.dot_dimension_numbers<[1], [0], [0], [1], [0, 0, 1, 1], [], []>} : vector<128x128xf32>, vector<128x128xf32>, vector<128x128xf32> -> vector<128x128xf32>
    %7 = arith.addf %3, %6 : vector<128x128xf32>
    %c0_6 = arith.constant 0 : index
    %c0_7 = arith.constant 0 : index
    %8 = vector.load %arg7[%c0_6, %c0_7] : memref<128x128xf32, #tpu.memory_space<vmem>>, vector<128x128xf32>
    tpu.vector_store %arg7[%c0_6, %c0_7], %7 {strides = array<i32>} : memref<128x128xf32, #tpu.memory_space<vmem>>, vector<128x128xf32>,
    %c0_i32_8 = arith.constant 0 : i32
    %9 = arith.cmpi eq, %arg2, %c0_i32_8 : i32
    %10 = arith.extui %9 : i1 to i32
    %c0_i32_9 = arith.constant 0 : i32
    %11 = arith.cmpi ne, %10, %c0_i32_9 : i32
    scf.if %11 {
      %c0_10 = arith.constant 0 : index
      %c0_11 = arith.constant 0 : index
      %12 = vector.load %arg7[%c0_10, %c0_11] : memref<128x128xf32, #tpu.memory_space<vmem>>, vector<128x128xf32>
      %13 = arith.truncf %12 : vector<128x128xf32> to vector<128x128xbf16>
      %c0_12 = arith.constant 0 : index
      %c0_13 = arith.constant 0 : index
      %14 = vector.load %arg6[%c0_12, %c0_13] : memref<128x128xbf16, #tpu.memory_space<vmem>>, vector<128x128xbf16>
      tpu.vector_store %arg6[%c0_12, %c0_13], %13 {strides = array<i32>} : memref<128x128xbf16, #tpu.memory_space<vmem>>, vector<128x128xbf16>,
    } else {
    }
    return
  }
  func.func @transform_0(%arg0: i32, %arg1: i32, %arg2: i32) -> (i32, i32) {
    %c0_i32 = arith.constant 0 : i32
    return %arg0, %arg2 : i32, i32
  }
  func.func @transform_1(%arg0: i32, %arg1: i32, %arg2: i32) -> (i32, i32) {
    %c0_i32 = arith.constant 0 : i32
    return %arg2, %arg1 : i32, i32
  }
  func.func @transform_2(%arg0: i32, %arg1: i32, %arg2: i32) -> (i32, i32) {
    %c0_i32 = arith.constant 0 : i32
    %c0_i32_0 = arith.constant 0 : i32
    return %c0_i32, %arg1 : i32, i32
  }
  func.func @transform_3(%arg0: i32, %arg1: i32, %arg2: i32) -> (i32, i32) {
    %c0_i32 = arith.constant 0 : i32
    return %arg0, %arg1 : i32, i32
  }
}

</mosaic_0001>

<bundles_post_ra>
// kernel: tpu_custom_call.1
= control target key start
LH: loop header
LB: loop body
LE: loop exit
PB: predicated region body
PF: predicated region fallthrough
CT: control target
= control target key end

     0   :  { %8 = vsyncpa [#allocation4], 0  ;;  %s499_s0 = inlined_call_operand.hbm [shape: f32[128,128], index: 0, kind: input, shape index: {}]   ;;  %s500_s1 = inlined_call_operand.hbm [shape: f32[128,128], index: 1, kind: input, shape index: {}]   ;;  %s501_s2 = inlined_call_operand.vmem [shape: f32[1,128], index: 2, kind: input, shape index: {}]   ;;  %s502_s3 = inlined_call_operand.hbm [shape: bf16[128,128], index: 3, kind: output, shape index: {}]  }
   0x1   :  { %9 = vsyncpa [#allocation7], 0 }
   0x2   :  { %10 = vsyncpa [#allocation5], 0  ;;  %s15_s14 = sshll.u32 %s499_s0, 4  ;;  %s463_s15 = smov [#allocation3]   ;;  %s16_s14 = int_to_ptr.hbm [resolvable:$true] %s15_s14 }
   0x3   :  { %s17_s16 = sshll.u32 %s463_s15, 4  ;;  %s28_s19 = sshll.u32 %s500_s1, 4  ;;  %s18_s16 = int_to_ptr.vmem [resolvable:$true] %s17_s16  ;;  %s29_s19 = int_to_ptr.hbm [resolvable:$true] %s28_s19 }
   0x4   :  { %s464_s20 = smov 128   ;;  %s465_s2 = smov 8  }
   0x5   :  { %23 = dma.hbm_to_vmem [thread:$0]  %s16_s14, 2048, %s18_s16, [#allocation4], %s464_s20, %s464_s20, %s465_s2  }
   0x6   :  { %s466_s21 = smov [#allocation6]  }
   0x7   :  { %s30_s22 = sshll.u32 %s466_s21, 4  ;;  %s31_s22 = int_to_ptr.vmem [resolvable:$true] %s30_s22 }
   0x8   :  { %36 = dma.hbm_to_vmem [thread:$0]  %s29_s19, 2048, %s31_s22, [#allocation7], %s464_s20, %s464_s20, %s465_s2  }
   0x9   :  { %457 = dma.done.wait [#allocation4], 2048  }
   0xa   :  { %458 = vsyncadd [#allocation4], 4294965248 }
   0xb   :  { %459 = dma.done.wait [#allocation7], 2048  }
   0xc   :  { %460 = vsyncadd [#allocation7], 4294965248  ;;  %v114_v0 = vld [vmem:[#allocation6 + $0x78] sm:$0xff]  ;;  %v113_v1 = vld [vmem:[#allocation6 + $0x70] sm:$0xff]  ;;  %s467_s0 = smov [#allocation8]   ;;  %s269_s25 = sshll.u32 %s502_s3, 4  ;;  %s270_s25 = int_to_ptr.hbm [resolvable:$true] %s269_s25 }
   0xd   :  { %115 = vmatpush.msra.mxu0 %v114_v0  ;;  %330 = vmatpush.msra.mxu1 %v114_v0  ;;  %v112_v2 = vld [vmem:[#allocation6 + $0x68] sm:$0xff]  ;;  %v111_v3 = vld [vmem:[#allocation6 + $0x60] sm:$0xff]  ;;  %v110_v4 = vld [vmem:[#allocation6 + $0x58] sm:$0xff]  ;;  %s267_s1 = sshll.u32 %s467_s0, 4  ;;  %s468_s26 = smov 64   ;;  %s268_s1 = int_to_ptr.vmem [resolvable:$true] %s267_s1 }
   0xe   :  { %331 = vmatpush.msra.mxu2 %v114_v0  ;;  %332 = vmatpush.msra.mxu3 %v114_v0  ;;  %v109_v5 = vld [vmem:[#allocation6 + $0x50] sm:$0xff]  ;;  %v108_v6 = vld [vmem:[#allocation6 + $0x48] sm:$0xff]  ;;  %v107_v7 = vld [vmem:[#allocation6 + $0x40] sm:$0xff]  ;;  %s469_s27 = smov 4  }
   0xf   :  { %116 = vmatpush.msra.mxu0 %v113_v1  ;;  %333 = vmatpush.msra.mxu1 %v113_v1  ;;  %v106_v8 = vld [vmem:[#allocation6 + $0x38] sm:$0xff]  ;;  %v105_v9 = vld [vmem:[#allocation6 + $0x30] sm:$0xff]  ;;  %v104_v10 = vld [vmem:[#allocation6 + $0x28] sm:$0xff] }
  0x10   :  { %334 = vmatpush.msra.mxu2 %v113_v1  ;;  %335 = vmatpush.msra.mxu3 %v113_v1  ;;  %v103_v11 = vld [vmem:[#allocation6 + $0x20] sm:$0xff]  ;;  %v102_v12 = vld [vmem:[#allocation6 + $0x18] sm:$0xff]  ;;  %v101_v13 = vld [vmem:[#allocation6 + $0x10] sm:$0xff] }
  0x11   :  { %117 = vmatpush.msra.mxu0 %v112_v2  ;;  %336 = vmatpush.msra.mxu1 %v112_v2  ;;  %v100_v14 = vld [vmem:[#allocation6 + $0x8] sm:$0xff]  ;;  %v99_v15 = vld [vmem:[#allocation6] sm:$0xff]  ;;  %v85_v24 = vld [vmem:[#allocation3 + $0x10] sm:$0xff] }
  0x12   :  { %337 = vmatpush.msra.mxu2 %v112_v2  ;;  %338 = vmatpush.msra.mxu3 %v112_v2  ;;  %v83_v16 = vld [vmem:[#allocation3] sm:$0xff]  ;;  %v84_v20 = vld [vmem:[#allocation3 + $0x8] sm:$0xff]  ;;  %v89_v25 = vld [vmem:[#allocation3 + $0x30] sm:$0xff] }
  0x13   :  { %118 = vmatpush.msra.mxu0 %v111_v3  ;;  %339 = vmatpush.msra.mxu1 %v111_v3  ;;  %v87_v17 = vld [vmem:[#allocation3 + $0x20] sm:$0xff]  ;;  %v88_v21 = vld [vmem:[#allocation3 + $0x28] sm:$0xff]  ;;  %v93_v26 = vld [vmem:[#allocation3 + $0x50] sm:$0xff] }
  0x14   :  { %340 = vmatpush.msra.mxu2 %v111_v3  ;;  %341 = vmatpush.msra.mxu3 %v111_v3  ;;  %v91_v18 = vld [vmem:[#allocation3 + $0x40] sm:$0xff]  ;;  %v92_v22 = vld [vmem:[#allocation3 + $0x48] sm:$0xff]  ;;  %v97_v27 = vld [vmem:[#allocation3 + $0x70] sm:$0xff] }
  0x15   :  { %119 = vmatpush.msra.mxu0 %v110_v4  ;;  %342 = vmatpush.msra.mxu1 %v110_v4  ;;  %v95_v19 = vld [vmem:[#allocation3 + $0x60] sm:$0xff]  ;;  %v96_v23 = vld [vmem:[#allocation3 + $0x68] sm:$0xff]  ;;  %v86_v28 = vld [vmem:[#allocation3 + $0x18] sm:$0xff] }
  0x16   :  { %343 = vmatpush.msra.mxu2 %v110_v4  ;;  %344 = vmatpush.msra.mxu3 %v110_v4  ;;  %v90_v29 = vld [vmem:[#allocation3 + $0x38] sm:$0xff] }
  0x17   :  { %120 = vmatpush.msra.mxu0 %v109_v5  ;;  %345 = vmatpush.msra.mxu1 %v109_v5  ;;  %v94_v30 = vld [vmem:[#allocation3 + $0x58] sm:$0xff] }
  0x18   :  { %346 = vmatpush.msra.mxu2 %v109_v5  ;;  %347 = vmatpush.msra.mxu3 %v109_v5  ;;  %v98_v31 = vld [vmem:[#allocation3 + $0x78] sm:$0xff] }
  0x19   :  { %121 = vmatpush.msra.mxu0 %v108_v6  ;;  %348 = vmatpush.msra.mxu1 %v108_v6 }
  0x1a   :  { %349 = vmatpush.msra.mxu2 %v108_v6  ;;  %350 = vmatpush.msra.mxu3 %v108_v6 }
  0x1b   :  { %122 = vmatpush.msra.mxu0 %v107_v7  ;;  %351 = vmatpush.msra.mxu1 %v107_v7 }
  0x1c   :  { %352 = vmatpush.msra.mxu2 %v107_v7  ;;  %353 = vmatpush.msra.mxu3 %v107_v7 }
  0x1d   :  { %123 = vmatpush.msra.mxu0 %v106_v8  ;;  %354 = vmatpush.msra.mxu1 %v106_v8 }
  0x1e   :  { %355 = vmatpush.msra.mxu2 %v106_v8  ;;  %356 = vmatpush.msra.mxu3 %v106_v8 }
  0x1f   :  { %124 = vmatpush.msra.mxu0 %v105_v9  ;;  %357 = vmatpush.msra.mxu1 %v105_v9 }
  0x20   :  { %358 = vmatpush.msra.mxu2 %v105_v9  ;;  %359 = vmatpush.msra.mxu3 %v105_v9 }
  0x21   :  { %125 = vmatpush.msra.mxu0 %v104_v10  ;;  %360 = vmatpush.msra.mxu1 %v104_v10 }
  0x22   :  { %361 = vmatpush.msra.mxu2 %v104_v10  ;;  %362 = vmatpush.msra.mxu3 %v104_v10 }
  0x23   :  { %126 = vmatpush.msra.mxu0 %v103_v11  ;;  %363 = vmatpush.msra.mxu1 %v103_v11 }
  0x24   :  { %364 = vmatpush.msra.mxu2 %v103_v11  ;;  %365 = vmatpush.msra.mxu3 %v103_v11 }
  0x25   :  { %127 = vmatpush.msra.mxu0 %v102_v12  ;;  %366 = vmatpush.msra.mxu1 %v102_v12 }
  0x26   :  { %367 = vmatpush.msra.mxu2 %v102_v12  ;;  %368 = vmatpush.msra.mxu3 %v102_v12 }
  0x27   :  { %128 = vmatpush.msra.mxu0 %v101_v13  ;;  %369 = vmatpush.msra.mxu1 %v101_v13 }
  0x28   :  { %370 = vmatpush.msra.mxu2 %v101_v13  ;;  %371 = vmatpush.msra.mxu3 %v101_v13 }
  0x29   :  { %129 = vmatpush.msra.mxu0 %v100_v14  ;;  %372 = vmatpush.msra.mxu1 %v100_v14 }
  0x2a   :  { %373 = vmatpush.msra.mxu2 %v100_v14  ;;  %374 = vmatpush.msra.mxu3 %v100_v14 }
  0x2b   :  { %130 = vmatpush.msra.mxu0 %v99_v15  ;;  %375 = vmatpush.msra.mxu1 %v99_v15 }
  0x2c   :  { %376 = vmatpush.msra.mxu2 %v99_v15  ;;  %377 = vmatpush.msra.mxu3 %v99_v15 }
  0x2d   :  { %131 = vmatmul.f32.vlgmr.msra.gmra.mxu0 %v83_v16  ;;  %143 = vmatmul.f32.vlgmr.msra.gmra.mxu1 %v87_v17 }
  0x2e   :  { %155 = vmatmul.f32.vlgmr.msra.gmra.mxu2 %v91_v18  ;;  %167 = vmatmul.f32.vlgmr.msra.gmra.mxu3 %v95_v19 }
  0x35   :  { %134 = vmatmul.f32.gmra.mxu0 %v84_v20  ;;  %146 = vmatmul.f32.gmra.mxu1 %v88_v21 }
  0x36   :  { %158 = vmatmul.f32.gmra.mxu2 %v92_v22  ;;  %170 = vmatmul.f32.gmra.mxu3 %v96_v23 }
  0x3d   :  { %137 = vmatmul.f32.gmra.mxu0 %v85_v24  ;;  %149 = vmatmul.f32.gmra.mxu1 %v89_v25 }
  0x3e   :  { %161 = vmatmul.f32.gmra.mxu2 %v93_v26  ;;  %173 = vmatmul.f32.gmra.mxu3 %v97_v27 }
  0x45   :  { %140 = vmatmul.f32.gmra.mxu0 %v86_v28  ;;  %152 = vmatmul.f32.gmra.mxu1 %v90_v29 }
  0x46   :  { %164 = vmatmul.f32.gmra.mxu2 %v94_v30  ;;  %176 = vmatmul.f32.gmra.mxu3 %v98_v31 }
  0xaa   :  { %v132_v32 = vpop.f32.mrf.mxu0  ;;  %v144_v33 = vpop.f32.mrf.mxu1 }
  0xb1   :  { %v156_v34 = vpop.f32.mrf.mxu2  ;;  %v168_v35 = vpop.f32.mrf.mxu3 }
  0xb2   :  { %v135_v36 = vpop.f32.mrf.mxu0  ;;  %v147_v37 = vpop.f32.mrf.mxu1 }
  0xb3   :  { %v286_v38 = vpack.c.bf16 %v135_v36, %v132_v32  ;;  %v296_v39 = vpack.c.bf16 %v147_v37, %v144_v33 }
  0xb5   :  { %287 = vst [vmem:[#allocation8] sm:$0xff] %v286_v38  }
  0xb6   :  { %324 = vst [vmem:[#allocation8 + $0x10] sm:$0xff] %v296_v39  }
  0xb9   :  { %v159_v40 = vpop.f32.mrf.mxu2  ;;  %v171_v41 = vpop.f32.mrf.mxu3 }
  0xba   :  { %v306_v42 = vpack.c.bf16 %v159_v40, %v156_v34  ;;  %v316_v43 = vpack.c.bf16 %v171_v41, %v168_v35  ;;  %v138_v44 = vpop.f32.mrf.mxu0  ;;  %v150_v45 = vpop.f32.mrf.mxu1 }
  0xbc   :  { %326 = vst [vmem:[#allocation8 + $0x20] sm:$0xff] %v306_v42  }
  0xbd   :  { %328 = vst [vmem:[#allocation8 + $0x30] sm:$0xff] %v316_v43  }
  0xc1   :  { %v162_v46 = vpop.f32.mrf.mxu2  ;;  %v174_v47 = vpop.f32.mrf.mxu3 }
  0xc2   :  { %v141_v48 = vpop.f32.mrf.mxu0  ;;  %v153_v49 = vpop.f32.mrf.mxu1 }
  0xc3   :  { %v291_v50 = vpack.c.bf16 %v141_v48, %v138_v44  ;;  %v301_v51 = vpack.c.bf16 %v153_v49, %v150_v45 }
  0xc5   :  { %323 = vst [vmem:[#allocation8 + $0x8] sm:$0xff] %v291_v50  }
  0xc6   :  { %325 = vst [vmem:[#allocation8 + $0x18] sm:$0xff] %v301_v51  }
  0xc9   :  { %v165_v52 = vpop.f32.mrf.mxu2  ;;  %v177_v53 = vpop.f32.mrf.mxu3 }
  0xca   :  { %v311_v54 = vpack.c.bf16 %v165_v52, %v162_v46  ;;  %v321_v55 = vpack.c.bf16 %v177_v53, %v174_v47 }
  0xcc   :  { %327 = vst [vmem:[#allocation8 + $0x28] sm:$0xff] %v311_v54  }
  0xcd   :  { %329 = vst [vmem:[#allocation8 + $0x38] sm:$0xff] %v321_v55  }
  0xce   :  { %275 = dma.vmem_to_hbm [thread:$0]  %s268_s1, 1024, %s270_s25, [#allocation5], %s468_s26, %s468_s26, %s469_s27  }
  0xcf   :  { %461 = dma.done.wait [#allocation5], 1024  }
  0xd0   :  { %462 = vsyncadd [#allocation5], 4294966272 }
  0xd1   :  { %280 = vsyncpa [#allocation4], 1 }
  0xd2   :  { %281 = vsyncpa [#allocation7], 1 }
  0xd3   :  { %282 = vsyncpa [#allocation5], 1 }

</bundles_post_ra>
